<compile_context>
chip_gen: v7x
topology: tpu7x:2x2x1
jax: 0.10.0
libtpu: 0.0.40
codegen_flags: <defaults>
</compile_context>

<pallas_src>
import jax
import jax.numpy as jnp
from jax.experimental import pallas as pl
from jax.experimental.pallas import tpu as pltpu


_BS_MAX = 32768            # lane-dim tile cap (multiple of 128)
_TILE_TARGET_BYTES = 1 << 20   # ~1 MiB per image tile (x2 buffers x in/out ~ 4 MiB)
_BR_CAP = 1024             # sublane-dim tile cap (multiple of 8)


def _normalization_kernel(mean_ref, inv_std_ref, img_ref, out_ref):
    # mean_ref / inv_std_ref: (BR, 1) VMEM columns, broadcast over the lane dim.
    # img_ref / out_ref:      (BR, BS) VMEM tiles.
    out_ref[...] = (img_ref[...] - mean_ref[...]) * inv_std_ref[...]


def _round_up(x, m):
    return ((x + m - 1) // m) * m


def _pick_tiles(R, S, itemsize):
    # Lane dim: full extent (always legal) or a large multiple of 128.
    BS = S if S <= _BS_MAX else _BS_MAX
    # Sublane dim: full extent if tiny, else multiples of 8 up to ~1 MiB tiles.
    if R <= 8:
        BR = R
    else:
        rows = max(8, (_TILE_TARGET_BYTES // max(1, BS * itemsize)) // 8 * 8)
        BR = min(rows, _round_up(R, 8), _BR_CAP)
    return BR, BS


def normalization(img, mean, std):
    """(img - mean) / std with mean/std broadcast over (C, 1, 1), NCHW layout."""
    N, C, H, W = img.shape
    R = N * C          # one row per (n, c) spatial plane
    S = H * W          # flattened spatial extent (lane-dense last dim)
    dtype = img.dtype

    # Precompute 1/std in f32 (one divide per channel, done once in XLA),
    # then cast to the image dtype so HBM traffic / VPU compute stays in-dtype.
    mean_f32 = jnp.asarray(mean, dtype=jnp.float32).reshape(C)
    std_f32 = jnp.asarray(std, dtype=jnp.float32).reshape(C)
    inv_std_f32 = 1.0 / std_f32

    mean_rows = jnp.tile(mean_f32, N).reshape(R, 1).astype(dtype)
    inv_rows = jnp.tile(inv_std_f32, N).reshape(R, 1).astype(dtype)

    img2d = img.reshape(R, S)   # contiguous reshape: metadata-only in XLA

    BR, BS = _pick_tiles(R, S, jnp.dtype(dtype).itemsize)
    grid = (pl.cdiv(R, BR), pl.cdiv(S, BS))

    out2d = pl.pallas_call(
        _normalization_kernel,
        out_shape=jax.ShapeDtypeStruct((R, S), dtype),
        grid_spec=pltpu.PrefetchScalarGridSpec(
            num_scalar_prefetch=0,
            grid=grid,
            in_specs=[
                pl.BlockSpec((BR, 1), lambda i, j: (i, 0)),   # per-row mean
                pl.BlockSpec((BR, 1), lambda i, j: (i, 0)),   # per-row 1/std
                pl.BlockSpec((BR, BS), lambda i, j: (i, j)),  # image tile
            ],
            out_specs=pl.BlockSpec((BR, BS), lambda i, j: (i, j)),
        ),
        compiler_params=pltpu.CompilerParams(
            dimension_semantics=("parallel", "parallel")),
    )(mean_rows, inv_rows, img2d)

    return out2d.reshape(N, C, H, W)


if __name__ == "__main__":
    key = jax.random.PRNGKey(0)

    N, C, H, W = 2, 3, 16, 16
    img = jax.random.uniform(key, (N, C, H, W), dtype=jnp.float32)

    # Deterministic parameters (same values used in the classic NST script).
    mean = jnp.array([0.485, 0.456, 0.406], dtype=jnp.float32)
    std = jnp.array([0.229, 0.224, 0.225], dtype=jnp.float32)

    out = normalization(img, mean, std)
    out = jax.block_until_ready(out)

    # Reference check in plain JAX (exact divide vs kernel's mul-by-reciprocal,
    # so allow a few ULPs of slack).
    ref = (img - mean.reshape(C, 1, 1)) / std.reshape(C, 1, 1)
    assert out.shape == (N, C, H, W)
    assert jnp.allclose(out, ref, atol=1e-5, rtol=1e-5)

    print("KERNEL_OK")
</pallas_src>

<mosaic_0001>
module attributes {stable_mosaic.version = 11 : i64} {
  func.func @_normalization_kernel(%arg0: i32, %arg1: i32, %arg2: memref<6x1xf32, #tpu.memory_space<vmem>>, %arg3: memref<6x1xf32, #tpu.memory_space<vmem>>, %arg4: memref<6x256xf32, #tpu.memory_space<vmem>>, %arg5: memref<6x256xf32, #tpu.memory_space<vmem>>) attributes {dimension_semantics = [#tpu.dimension_semantics<parallel>, #tpu.dimension_semantics<parallel>], iteration_bounds = array<i64: 1, 1>, scalar_prefetch = 0 : i64, scratch_operands = 0 : i64, tpu.core_type = #tpu.core_type<tc>, window_params = [{transform_indices = @transform_0, window_bounds = array<i64: 6, 1>}, {transform_indices = @transform_1, window_bounds = array<i64: 6, 1>}, {transform_indices = @transform_2, window_bounds = array<i64: 6, 256>}, {transform_indices = @transform_3, window_bounds = array<i64: 6, 256>}]} {
    %c0 = arith.constant 0 : index
    %c0_0 = arith.constant 0 : index
    %0 = vector.load %arg4[%c0, %c0_0] : memref<6x256xf32, #tpu.memory_space<vmem>>, vector<6x256xf32>
    %c0_1 = arith.constant 0 : index
    %c0_2 = arith.constant 0 : index
    %1 = vector.load %arg2[%c0_1, %c0_2] : memref<6x1xf32, #tpu.memory_space<vmem>>, vector<6x1xf32>
    %2 = vector.broadcast %1 : vector<6x1xf32> to vector<6x256xf32>
    %3 = arith.subf %0, %2 : vector<6x256xf32>
    %c0_3 = arith.constant 0 : index
    %c0_4 = arith.constant 0 : index
    %4 = vector.load %arg3[%c0_3, %c0_4] : memref<6x1xf32, #tpu.memory_space<vmem>>, vector<6x1xf32>
    %5 = vector.broadcast %4 : vector<6x1xf32> to vector<6x256xf32>
    %6 = arith.mulf %3, %5 : vector<6x256xf32>
    %c0_5 = arith.constant 0 : index
    %c0_6 = arith.constant 0 : index
    %7 = vector.load %arg5[%c0_5, %c0_6] : memref<6x256xf32, #tpu.memory_space<vmem>>, vector<6x256xf32>
    tpu.vector_store %arg5[%c0_5, %c0_6], %6 {strides = array<i32>} : memref<6x256xf32, #tpu.memory_space<vmem>>, vector<6x256xf32>,
    return
  }
  func.func @transform_0(%arg0: i32, %arg1: i32) -> (i32, i32) {
    %c0_i32 = arith.constant 0 : i32
    %c0_i32_0 = arith.constant 0 : i32
    return %arg0, %c0_i32 : i32, i32
  }
  func.func @transform_1(%arg0: i32, %arg1: i32) -> (i32, i32) {
    %c0_i32 = arith.constant 0 : i32
    %c0_i32_0 = arith.constant 0 : i32
    return %arg0, %c0_i32 : i32, i32
  }
  func.func @transform_2(%arg0: i32, %arg1: i32) -> (i32, i32) {
    %c0_i32 = arith.constant 0 : i32
    return %arg0, %arg1 : i32, i32
  }
  func.func @transform_3(%arg0: i32, %arg1: i32) -> (i32, i32) {
    %c0_i32 = arith.constant 0 : i32
    return %arg0, %arg1 : i32, i32
  }
}

</mosaic_0001>

<bundles_post_ra>
// kernel: tpu_custom_call.1
= control target key start
LH: loop header
LB: loop body
LE: loop exit
PB: predicated region body
PF: predicated region fallthrough
CT: control target
= control target key end

     0   :  { %v76_v1 = vmov 0   ;;  %s122_s0 = inlined_call_operand.vmem [shape: f32[6,1], index: 0, kind: input, shape index: {}]   ;;  %s123_s1 = inlined_call_operand.vmem [shape: f32[6,1], index: 1, kind: input, shape index: {}]   ;;  %s124_s2 = inlined_call_operand.vmem [shape: f32[6,256], index: 2, kind: input, shape index: {}]   ;;  %s125_s3 = inlined_call_operand.hbm [shape: f32[6,256], index: 3, kind: output, shape index: {}]  }
   0x1   :  { %v17_v0 = vld [vmem:[%s122_s0] sm:$0x3f]  ;;  %51 = vset.pattern.permute.xlu0 %v76_v1 }
   0x2   :  { %8 = vsyncpa [#allocation3], 0  ;;  %20 = vperm.xlu0 %51, %v17_v0   ;;  %v25_v2 = vld [vmem:[%s123_s1] sm:$0x3f]  ;;  %v16_v5 = vld [vmem:[%s124_s2 + $0x8] sm:$0x3f] }
   0x3   :  { %v15_v4 = vld [vmem:[%s124_s2] sm:$0x3f]  ;;  %s77_s20 = smov [#allocation2]  }
   0x4   :  { %s41_s0 = sshll.u32 %s77_s20, 4  ;;  %s42_s0 = int_to_ptr.vmem [resolvable:$true] %s41_s0 }
   0x5   :  { %s52_s1 = scalar_lea.vmem %s42_s0, 256  ;;  %p57_p1 = scmp.lt.s32.totalorder %s42_s0, %s42_s0 }
   0x6   :  { %28 = vperm.xlu0 %51, %v25_v2   ;;  %p53_p0 = scmp.ne.s32.totalorder %s42_s0, %s52_s1  ;;  %p58_p2 = scmp.lt.s32.totalorder %s52_s1, %s52_s1 }
   0x8   :  { %p59_p3 = por %p58_p2, %p57_p1 }
   0xa   :  { %p60_p4 = pnand %p59_p3, %p53_p0 }
  0x81   :  { %v21_v3 = vpop.permute.xlu0 %20 }
  0x82   :  { %v23_v6 = vsub.f32 %v15_v4, %v21_v3  ;;  %v24_v7 = vsub.f32 %v16_v5, %v21_v3 }
  0x85   :  { %v29_v8 = vpop.permute.xlu0 %28 }
  0x86   :  { %v31_v9 = vmul.f32 %v29_v8, %v23_v6  ;;  %v32_v10 = vmul.f32 %v29_v8, %v24_v7 }
  0x88   :  { %33 = vst [vmem:[#allocation2] sm:$0x3f] %v31_v9  ;;  %34 = vst [vmem:[#allocation2 + $0x8] sm:$0x3f] %v32_v10 }
  0x89   :  { %63 = shalt.err (!%p60_p4)
}
  0x8a   :  { %s64_s2 = scalar_lea.hbm %s125_s3, 256 }
  0x8b   :  { %p65_p5 = scmp.ne.s32.totalorder %s125_s3, %s64_s2  ;;  %p68_p6 = scmp.lt.u32.totalorder %s64_s2, %s125_s3 }
  0x8d   :  { %p70_p7 = pnand %p68_p6, %p65_p5 }
  0x8f   :  { %73 = shalt.err (!%p70_p7)
}
  0x90   :  { %44 = dma.vmem_to_hbm [thread:$0]  %s42_s0, 256, %s125_s3, [#allocation3]  }
  0x91   :  { %74 = dma.done.wait [#allocation3], 256  }
  0x92   :  { %75 = vsyncadd [#allocation3], 4294967040 }
  0x93   :  { %48 = vsyncpa [#allocation3], 1 }

</bundles_post_ra>
